<compile_context>
chip_gen: v6e
topology: v6e:2x2x1
jax: 0.10.0
libtpu: 0.0.40
codegen_flags: <defaults>
</compile_context>

<pallas_src>
import jax
import jax.numpy as jnp
import numpy as np
from jax.experimental import pallas as pl
from jax.experimental.pallas import tpu as pltpu

EPS = 1e-6


# --------------------------------------------------------------------------- #
# Kernels
# --------------------------------------------------------------------------- #
def _layernorm_f32(x32, gamma, beta):
    """a_2 * (x - mean) / (std + eps) + b_2 with torch-style unbiased std."""
    d = x32.shape[-1]
    mean = jnp.mean(x32, axis=-1, keepdims=True)
    diff = x32 - mean
    var_unbiased = jnp.sum(diff * diff, axis=-1, keepdims=True) / (d - 1)
    # approx=True -> EUP vrcp slot (frees VALU); error << the bf16 MXU rounding
    # already accepted downstream.
    inv = pl.reciprocal(jnp.sqrt(var_unbiased) + EPS, approx=True)
    # TODO(synk): optionally fuse mean/sumsq into one reduction sweep after
    # validating cancellation numerics for the target data distribution.
    return gamma * (diff * inv) + beta


def _fused_kernel(x_ref, gamma_ref, beta_ref, w_ref, b_ref, o_ref):
    """nn == 1 (whole weight resident): LN + Linear + residual fully fused."""
    x32 = x_ref[...].astype(jnp.float32)
    nr = _layernorm_f32(x32, gamma_ref[...], beta_ref[...])
    sr = jnp.dot(nr.astype(jnp.bfloat16), w_ref[...],
                 preferred_element_type=jnp.float32) + b_ref[...]
    # dropout (inference): identity.
    o_ref[...] = (x32 + sr).astype(o_ref.dtype)


def _slab_kernel(x_full_ref, x_res_ref, gamma_ref, beta_ref, w_ref, b_ref,
                 o_ref, nr_ref):
    """nn > 1 (weight streamed in (D, tn) column slabs).

    LayerNorm is hoisted out of the j (slab) loop: computed once per row tile at
    j == 0 into a persistent bf16 VMEM scratch; every j then only does the slab
    matmul plus the residual column add.
    """
    @pl.when(pl.program_id(1) == 0)
    def _():
        x32 = x_full_ref[...].astype(jnp.float32)
        nr_ref[...] = _layernorm_f32(
            x32, gamma_ref[...], beta_ref[...]).astype(jnp.bfloat16)

    sr = jnp.dot(nr_ref[...], w_ref[...],
                 preferred_element_type=jnp.float32) + b_ref[...]
    # dropout (inference): identity; residual add in f32.
    o_ref[...] = (x_res_ref[...].astype(jnp.float32) + sr).astype(o_ref.dtype)


# --------------------------------------------------------------------------- #
# Wrapper
# --------------------------------------------------------------------------- #
def _vmem_capacity_bytes():
    try:
        return int(pltpu.get_tpu_info().vmem_capacity_bytes)
    except Exception:
        return 64 * 1024 * 1024  # conservative: assume the smallest (v7x per-TC)


def sublayer_connection(x, gamma, beta, w, b, *, tm=None, tn=None,
                        vmem_limit_bytes=None):
    """x: [B, S, D]; gamma/beta/b: [D]; w: [D, D]."""
    B, S, D = x.shape
    rows = B * S

    # ---- generation-aware tiling defaults (sweep in production) -------------
    # v5e/v6e: 128 MiB VMEM  -> big tiles, halve weight re-streaming.
    # v7x:      64 MiB VMEM  -> smaller tiles so streamed weight + LN temps fit.
    big_vmem = _vmem_capacity_bytes() >= 100 * 1024 * 1024
    if tm is None:
        tm = 512 if big_vmem else (128 if D >= 4096 else 256)
    if tn is None:
        tn = D if D <= 2048 else (1024 if big_vmem else 512)
    if vmem_limit_bytes is None:
        vmem_limit_bytes = (100 if big_vmem else 48) * 1024 * 1024

    # Weight N-slab size must divide D and be lane-dense; otherwise fall back to
    # the fully fused kernel.  (Production D should be a multiple of 128.)
    if tn != D and (tn % 128 != 0 or D % tn != 0):
        tn = D
    nn = 1 if tn == D else D // tn

    # ---- row tile: clamp for tiny inputs, keep a multiple of 8, and keep at
    # least 2 row tiles so the "parallel" i axis can shard across v7x's 2 TCs ---
    tm = max(8, min(tm, pl.cdiv(rows, 8) * 8))
    tm -= tm % 8
    while tm > 8 and pl.cdiv(rows, tm) < 2:
        tm = max(8, (tm // 2) - (tm // 2) % 8)
    rows_padded = pl.cdiv(rows, tm) * tm

    x2 = x.reshape(rows, D)
    if rows_padded != rows:
        # Padded rows give finite garbage (diff = 0) and are sliced off below.
        x2 = jnp.pad(x2, ((0, rows_padded - rows), (0, 0)))

    gamma2 = gamma.reshape(1, D).astype(jnp.float32)
    beta2 = beta.reshape(1, D).astype(jnp.float32)
    b2 = b.reshape(1, D).astype(jnp.float32)
    w_bf16 = w.astype(jnp.bfloat16)      # bf16 MXU operand (halves weight DMA/VMEM)

    out_shape = jax.ShapeDtypeStruct((rows_padded, D), x.dtype)

    if nn == 1:
        grid_spec = pltpu.PrefetchScalarGridSpec(
            num_scalar_prefetch=0,
            grid=(rows_padded // tm,),
            in_specs=[
                pl.BlockSpec((tm, D), lambda i: (i, 0)),   # x rows
                pl.BlockSpec((1, D), lambda i: (0, 0)),    # gamma
                pl.BlockSpec((1, D), lambda i: (0, 0)),    # beta
                pl.BlockSpec((D, D), lambda i: (0, 0)),    # whole weight resident
                pl.BlockSpec((1, D), lambda i: (0, 0)),    # bias
            ],
            out_specs=pl.BlockSpec((tm, D), lambda i: (i, 0)),
        )
        semantics = ("parallel",)
        args = (x2, gamma2, beta2, w_bf16, b2)
        kernel = _fused_kernel
    else:
        grid_spec = pltpu.PrefetchScalarGridSpec(
            num_scalar_prefetch=0,
            grid=(rows_padded // tm, nn),                  # j (N-slabs) innermost
            in_specs=[
                pl.BlockSpec((tm, D), lambda i, j: (i, 0)),   # x full row (LN, j-invariant)
                pl.BlockSpec((tm, tn), lambda i, j: (i, j)),  # x residual column slab
                pl.BlockSpec((1, D), lambda i, j: (0, 0)),    # gamma
                pl.BlockSpec((1, D), lambda i, j: (0, 0)),    # beta
                pl.BlockSpec((D, tn), lambda i, j: (0, j)),   # weight column slab
                pl.BlockSpec((1, tn), lambda i, j: (0, j)),   # bias column slab
            ],
            out_specs=pl.BlockSpec((tm, tn), lambda i, j: (i, j)),
            scratch_shapes=[pltpu.VMEM((tm, D), jnp.bfloat16)],  # hoisted LN result
        )
        semantics = ("parallel", "arbitrary")   # scratch carries state across j
        args = (x2, x2, gamma2, beta2, w_bf16, b2)
        kernel = _slab_kernel

    out = pl.pallas_call(
        kernel,
        out_shape=out_shape,
        grid_spec=grid_spec,
        compiler_params=pltpu.CompilerParams(
            dimension_semantics=semantics,
            vmem_limit_bytes=vmem_limit_bytes),
    )(*args)

    if rows_padded != rows:
        out = out[:rows]
    return out.reshape(B, S, D)


# --------------------------------------------------------------------------- #
# Reference + demo
# --------------------------------------------------------------------------- #
def _reference(x, gamma, beta, w, b):
    x32 = x.astype(jnp.float32)
    mean = jnp.mean(x32, axis=-1, keepdims=True)
    diff = x32 - mean
    var = jnp.sum(diff * diff, axis=-1, keepdims=True) / (x.shape[-1] - 1)
    std = jnp.sqrt(var)
    nr = gamma * diff / (std + EPS) + beta
    sr = nr @ w + b
    return (x32 + sr).astype(x.dtype)


def _run_case(key, B, S, D, **kwargs):
    kx, kw, kb = jax.random.split(key, 3)
    x = jax.random.normal(kx, (B, S, D), dtype=jnp.float32)
    gamma = jnp.ones((D,), dtype=jnp.float32)     # LayerNorm a_2 init
    beta = jnp.zeros((D,), dtype=jnp.float32)     # LayerNorm b_2 init
    w = jax.random.normal(kw, (D, D), dtype=jnp.float32) * 0.05
    b = jax.random.normal(kb, (D,), dtype=jnp.float32) * 0.05

    out = jax.block_until_ready(sublayer_connection(x, gamma, beta, w, b, **kwargs))
    ref = _reference(x, gamma, beta, w, b)
    # Tolerance loosened vs the pure-f32 reference: bf16 MXU operands
    # (f32 accumulation) + approx EUP reciprocal.
    np.testing.assert_allclose(np.asarray(out), np.asarray(ref),
                               rtol=2e-2, atol=2e-2)


if __name__ == "__main__":
    key = jax.random.PRNGKey(0)
    k1, k2 = jax.random.split(key)

    # Case 1: module-scale shapes (fused whole-weight path).
    _run_case(k1, B=2, S=8, D=32)

    # Case 2: exercises the streamed-weight (nn > 1) path with the hoisted
    # LayerNorm scratch (tn forced below D).
    _run_case(k2, B=2, S=8, D=256, tn=128)

    print("KERNEL_OK")
</pallas_src>

<mosaic_0001>
module attributes {stable_mosaic.version = 11 : i64} {
  func.func @_fused_kernel(%arg0: i32, %arg1: memref<8x32xf32, #tpu.memory_space<vmem>>, %arg2: memref<1x32xf32, #tpu.memory_space<vmem>>, %arg3: memref<1x32xf32, #tpu.memory_space<vmem>>, %arg4: memref<32x32xbf16, #tpu.memory_space<vmem>>, %arg5: memref<1x32xf32, #tpu.memory_space<vmem>>, %arg6: memref<8x32xf32, #tpu.memory_space<vmem>>) attributes {dimension_semantics = [#tpu.dimension_semantics<parallel>], iteration_bounds = array<i64: 2>, scalar_prefetch = 0 : i64, scratch_operands = 0 : i64, tpu.core_type = #tpu.core_type<tc>, window_params = [{transform_indices = @transform_0, window_bounds = array<i64: 8, 32>}, {pipeline_mode = #tpu.pipeline_mode<synchronous>, transform_indices = @transform_1, window_bounds = array<i64: 1, 32>}, {pipeline_mode = #tpu.pipeline_mode<synchronous>, transform_indices = @transform_2, window_bounds = array<i64: 1, 32>}, {pipeline_mode = #tpu.pipeline_mode<synchronous>, transform_indices = @transform_3, window_bounds = array<i64: 32, 32>}, {pipeline_mode = #tpu.pipeline_mode<synchronous>, transform_indices = @transform_4, window_bounds = array<i64: 1, 32>}, {transform_indices = @transform_5, window_bounds = array<i64: 8, 32>}]} {
    %c0 = arith.constant 0 : index
    %c0_0 = arith.constant 0 : index
    %0 = vector.load %arg1[%c0, %c0_0] : memref<8x32xf32, #tpu.memory_space<vmem>>, vector<8x32xf32>
    %c0_1 = arith.constant 0 : index
    %c0_2 = arith.constant 0 : index
    %1 = vector.load %arg2[%c0_1, %c0_2] : memref<1x32xf32, #tpu.memory_space<vmem>>, vector<1x32xf32>
    %c0_3 = arith.constant 0 : index
    %c0_4 = arith.constant 0 : index
    %2 = vector.load %arg3[%c0_3, %c0_4] : memref<1x32xf32, #tpu.memory_space<vmem>>, vector<1x32xf32>
    %cst = arith.constant dense<0.000000e+00> : vector<8xf32>
    %3 = vector.multi_reduction <add>, %0, %cst [1] : vector<8x32xf32> to vector<8xf32>
    %4 = vector.shape_cast %3 : vector<8xf32> to vector<8x1xf32>
    %cst_5 = arith.constant 3.200000e+01 : f32
    %5 = vector.broadcast %cst_5 : f32 to vector<8x1xf32>
    %6 = arith.divf %4, %5 : vector<8x1xf32>
    %7 = vector.broadcast %6 : vector<8x1xf32> to vector<8x32xf32>
    %8 = arith.subf %0, %7 : vector<8x32xf32>
    %9 = arith.mulf %8, %8 : vector<8x32xf32>
    %cst_6 = arith.constant dense<0.000000e+00> : vector<8xf32>
    %10 = vector.multi_reduction <add>, %9, %cst_6 [1] : vector<8x32xf32> to vector<8xf32>
    %11 = vector.shape_cast %10 : vector<8xf32> to vector<8x1xf32>
    %cst_7 = arith.constant 3.100000e+01 : f32
    %12 = vector.broadcast %cst_7 : f32 to vector<8x1xf32>
    %13 = arith.divf %11, %12 : vector<8x1xf32>
    %14 = math.sqrt %13 : vector<8x1xf32>
    %cst_8 = arith.constant 9.99999997E-7 : f32
    %15 = vector.broadcast %cst_8 : f32 to vector<8x1xf32>
    %16 = arith.addf %14, %15 : vector<8x1xf32>
    %17 = tpu.reciprocal %16 {approx = true} : vector<8x1xf32> -> vector<8x1xf32>
    %18 = vector.broadcast %17 : vector<8x1xf32> to vector<8x32xf32>
    %19 = arith.mulf %8, %18 : vector<8x32xf32>
    %20 = vector.broadcast %1 : vector<1x32xf32> to vector<8x32xf32>
    %21 = arith.mulf %20, %19 : vector<8x32xf32>
    %22 = vector.broadcast %2 : vector<1x32xf32> to vector<8x32xf32>
    %23 = arith.addf %21, %22 : vector<8x32xf32>
    %24 = arith.truncf %23 : vector<8x32xf32> to vector<8x32xbf16>
    %c0_9 = arith.constant 0 : index
    %c0_10 = arith.constant 0 : index
    %25 = vector.load %arg4[%c0_9, %c0_10] : memref<32x32xbf16, #tpu.memory_space<vmem>>, vector<32x32xbf16>
    %cst_11 = arith.constant dense<0.000000e+00> : vector<8x32xf32>
    %26 = tpu.matmul %24, %25, %cst_11 {dimension_numbers = #tpu.dot_dimension_numbers<[1], [0], [0], [1], [0, 0, 1, 1], [], []>} : vector<8x32xbf16>, vector<32x32xbf16>, vector<8x32xf32> -> vector<8x32xf32>
    %c0_12 = arith.constant 0 : index
    %c0_13 = arith.constant 0 : index
    %27 = vector.load %arg5[%c0_12, %c0_13] : memref<1x32xf32, #tpu.memory_space<vmem>>, vector<1x32xf32>
    %28 = vector.broadcast %27 : vector<1x32xf32> to vector<8x32xf32>
    %29 = arith.addf %26, %28 : vector<8x32xf32>
    %30 = arith.addf %0, %29 : vector<8x32xf32>
    %c0_14 = arith.constant 0 : index
    %c0_15 = arith.constant 0 : index
    %31 = vector.load %arg6[%c0_14, %c0_15] : memref<8x32xf32, #tpu.memory_space<vmem>>, vector<8x32xf32>
    tpu.vector_store %arg6[%c0_14, %c0_15], %30 {strides = array<i32>} : memref<8x32xf32, #tpu.memory_space<vmem>>, vector<8x32xf32>,
    return
  }
  func.func @transform_0(%arg0: i32) -> (i32, i32) {
    %c0_i32 = arith.constant 0 : i32
    %c0_i32_0 = arith.constant 0 : i32
    return %arg0, %c0_i32 : i32, i32
  }
  func.func @transform_1(%arg0: i32) -> (i32, i32) {
    %c0_i32 = arith.constant 0 : i32
    %c0_i32_0 = arith.constant 0 : i32
    %c0_i32_1 = arith.constant 0 : i32
    return %c0_i32, %c0_i32_0 : i32, i32
  }
  func.func @transform_2(%arg0: i32) -> (i32, i32) {
    %c0_i32 = arith.constant 0 : i32
    %c0_i32_0 = arith.constant 0 : i32
    %c0_i32_1 = arith.constant 0 : i32
    return %c0_i32, %c0_i32_0 : i32, i32
  }
  func.func @transform_3(%arg0: i32) -> (i32, i32) {
    %c0_i32 = arith.constant 0 : i32
    %c0_i32_0 = arith.constant 0 : i32
    %c0_i32_1 = arith.constant 0 : i32
    return %c0_i32, %c0_i32_0 : i32, i32
  }
  func.func @transform_4(%arg0: i32) -> (i32, i32) {
    %c0_i32 = arith.constant 0 : i32
    %c0_i32_0 = arith.constant 0 : i32
    %c0_i32_1 = arith.constant 0 : i32
    return %c0_i32, %c0_i32_0 : i32, i32
  }
  func.func @transform_5(%arg0: i32) -> (i32, i32) {
    %c0_i32 = arith.constant 0 : i32
    %c0_i32_0 = arith.constant 0 : i32
    return %arg0, %c0_i32 : i32, i32
  }
}

</mosaic_0001>

<bundles_post_ra>
// kernel: tpu_custom_call.1
= control target key start
LH: loop header
LB: loop body
LE: loop exit
PB: predicated region body
PF: predicated region fallthrough
CT: control target
= control target key end

     0   :  { %10 = vsyncpa [#allocation3], 0  ;;  %s901_s0 = inlined_call_operand.hbm [shape: f32[16,32], index: 0, kind: input, shape index: {}]   ;;  %s902_s1 = inlined_call_operand.vmem [shape: f32[1,32], index: 1, kind: input, shape index: {}]   ;;  %s903_s2 = inlined_call_operand.vmem [shape: f32[1,32], index: 2, kind: input, shape index: {}]   ;;  %s904_s3 = inlined_call_operand.hbm [shape: bf16[32,32], index: 3, kind: input, shape index: {}]   ;;  %s905_s4 = inlined_call_operand.vmem [shape: f32[1,32], index: 4, kind: input, shape index: {}]   ;;  %s906_s5 = inlined_call_operand.hbm [shape: f32[16,32], index: 5, kind: output, shape index: {}]  }
   0x1   :  { %12 = vsyncpa [#allocation3 + $0x1], 0 }
   0x2   :  { %13 = vsyncpa [#allocation6], 0 }
   0x3   :  { %14 = vsyncpa [#allocation4], 0 }
   0x4   :  { %16 = vsyncpa [#allocation4 + $0x1], 0  ;;  %s718_s18 = smov 0   ;;  %s720_s19 = smov 0  }
   0x5   :  { %s722_s20 = smov 0   ;;  %s724_s21 = smov 0  }
   0x6 LB: > { %s739_s22 = sadd.s32 4294967295, %s679_s21   ;;  %s459_s23 = sadd.s32 4294967294, %s679_s21   ;;  %s679_s21 = sphi %s724_s21, %s928_s21   ;;  %s675_s20 = sphi %s722_s20, %s927_s20   ;;  %s671_s19 = sphi %s720_s19, %s926_s19   ;;  %s667_s18 = sphi %s718_s18, %s925_s18  }
   0x7   : > { %p42_p0 = scmp.ne.s32.totalorder %s671_s19, %s667_s18  ;;  %p907_p1 = scmp.eq.s32.totalorder %s739_s22, 0 }
   0x8   : > { %p156_p3 = scmp.eq.s32.totalorder %s459_s23, 1  ;;  %p460_p5 = scmp.ge.s32.totalorder %s679_s21, 1 }
   0x9   : > { %p748_p4 = por %p907_p1, %p42_p0  ;;  %p163_p7 = scmp.lt.s32.totalorder %s679_s21, 3 }
   0xa   : > { %p753_p6 = por %p156_p3, %p42_p0  ;;  %s681_s27 = smov [#allocation5]  }
   0xb   : > { %s911_s24 = scalar_select %p748_p4, 1, 0 }
   0xc   : > { %s912_s25 = scalar_select %p753_p6, 1, 0 }
   0xd   : > { %p758_p8 = pnand %p460_p5, %p163_p7  ;;  %s181_s28 = sshll.u32 %s681_s27, 4  ;;  %s182_s28 = int_to_ptr.vmem [resolvable:$true] %s181_s28 }
   0xe   : > { %s772_s30 = sadd.s32 1, %s679_s21   ;;  %s29_s6 = sadd.s32 1, %s675_s20 }
   0xf   : > { %s913_s26 = scalar_select %p758_p8, 1, 0 }
  0x10   : > { %p498_p9 = pneg %p758_p8  ;;  %s26_s7 = ssub.s32 %s679_s21, %s772_s30 }
  0x11   : > { %s568_s8 = scalar_lea.vmem %s182_s28, 256  ;;  %p576_p5 = scmp.lt.s32.totalorder %s182_s28, %s182_s28 }
  0x12   : > { %p767_p11 = pnand %p498_p9, %p907_p1  ;;  %p569_p13 = scmp.ne.s32.totalorder %s182_s28, %s568_s8 }
  0x13   : > { %p577_p7 = scmp.lt.s32.totalorder %s568_s8, %s568_s8 }
  0x14   : > { %p559_p12 = pneg %p767_p11 }
  0x15   : > { %p578_p10 = por %p577_p7, %p576_p5 }
  0x16   : > { %p571_p0 = pnand %p569_p13, %p559_p12 }
  0x18   : > { %p572_p3 = pneg %p571_p0 }
  0x1a   : > { %p579_p2 = pnand %p578_p10, %p572_p3 }
  0x1c   : > { %582 = shalt.err (!%p579_p2)
}
  0x1d   : > { %s682_s9 = smov 64   ;;  %s683_s10 = smov 4  }
  0x1e   : > { %501 = dma.hbm_to_vmem [thread:$0]  (!%p767_p11), %s904_s3, 256, %s182_s28, [#allocation6], %s682_s9, %s682_s9, %s683_s10  }
  0x1f   : > { %p27_p9 = scmp.eq.s32.totalorder %s26_s7, 0  ;;  %p36_p12 = scmp.ne.s32.totalorder %s675_s20, %s671_s19 }
  0x20   : > { %p37_p10 = scmp.eq.s32.totalorder %s679_s21, 0  ;;  %p511_p2 = scmp.lt.s32.totalorder %s679_s21, 2 }
  0x21   : > { %s789_s13 = scalar_select %p27_p9, %s675_s20, %s29_s6  }
  0x22   : > { %p38_p13 = por %p37_p10, %p36_p12  ;;  %p915_p0 = scmp.eq.s32.totalorder %s739_s22, 1 }
  0x23   : > { %s198_s15 = sand.u32 1, %s675_s20   ;;  %s464_s16 = sshll.u32 %s679_s21, 7 }
  0x24   : > { %p793_p3 = por %p915_p0, %p36_p12  ;;  %s463_s17 = sshll.u32 %s198_s15, 3 }
  0x25   : > { %s802_s29 = scalar_lea.hbm %s901_s0, %s464_s16  ;;  %s202_s28 = scalar_lea.vmem [#allocation2], %s463_s17 }
  0x26   : > { %s916_s14 = scalar_select %p793_p3, 1, 0 }
  0x27   : > { %s209_s6 = sshll.u32 %s202_s28, 4  ;;  %p804_p11 = pnand %p511_p2, %p38_p13  ;;  %s210_s6 = int_to_ptr.vmem [resolvable:$true] %s209_s6 }
  0x28   : > { %s199_s8 = scalar_lea.sflag [#allocation3], %s198_s15  ;;  %s583_s9 = scalar_lea.hbm %s802_s29, 128 }
  0x29   : > { %p584_p5 = scmp.ne.s32.totalorder %s802_s29, %s583_s9  ;;  %p585_p7 = pneg %p804_p11 }
  0x2a   : > { %s588_s12 = scalar_lea.hbm %s901_s0, 256  ;;  %p589_p10 = scmp.lt.s32.totalorder %s802_s29, %s901_s0 }
  0x2b   : > { %p586_p9 = pnand %p585_p7, %p584_p5  ;;  %p590_p2 = scmp.lt.s32.totalorder %s588_s12, %s583_s9 }
  0x2d   : > { %p587_p12 = pneg %p586_p9  ;;  %p591_p13 = por %p590_p2, %p589_p10 }
  0x2f   : > { %p592_p0 = pnand %p591_p13, %p587_p12 }
  0x31   : > { %595 = shalt.err (!%p592_p0)
}
  0x32   : > { %s596_s23 = scalar_lea.vmem %s210_s6, 128  ;;  %s684_s15 = smov [#allocation2]  }
  0x33   : > { %p597_p1 = scmp.ne.s32.totalorder %s210_s6, %s596_s23  ;;  %s601_s27 = sshll.u32 %s684_s15, 4  ;;  %s602_s27 = int_to_ptr.vmem [resolvable:$false] %s601_s27 }
  0x34   : > { %s603_s28 = scalar_lea.vmem %s602_s27, 256  ;;  %p604_p5 = scmp.lt.s32.totalorder %s210_s6, %s602_s27 }
  0x35   : > { %p599_p6 = pnand %p597_p1, %p585_p7  ;;  %p605_p9 = scmp.lt.s32.totalorder %s603_s28, %s596_s23 }
  0x37   : > { %p600_p3 = pneg %p599_p6  ;;  %p606_p4 = por %p605_p9, %p604_p5 }
  0x39   : > { %p607_p8 = pnand %p606_p4, %p600_p3 }
  0x3b   : > { %610 = shalt.err (!%p607_p8)
}
  0x3c   : > { %505 = dma.hbm_to_vmem [thread:$0]  (!%p804_p11), %s802_s29, 128, %s210_s6, %s199_s8  }
  0x3d   : > { %p918_p12 = scmp.ne.s32.totalorder %s913_s26, 0 }
  0x3e   : > { %s825_s9 = sand.u32 (!%p918_p12), 1, %s671_s19   ;;  %p919_p1 = scmp.ne.s32.totalorder (!%p918_p12), %s911_s24, 0 }
  0x3f   : > { %218 = sbr.rel (%p918_p12) target bundleno = 612 (0x264), region = 40  ;;  %s466_s10 = sshll.u32 (!%p918_p12), %s825_s9, 3 }
  0x40   : > { %s221_s11 = scalar_lea.sflag (!%p918_p12), [#allocation3], %s825_s9  ;;  %s224_s12 = scalar_lea.vmem (!%p918_p12), [#allocation2], %s466_s10 }
  0x44   : > { %654 = dma.done.wait (%p919_p1), %s221_s11, 128  }
  0x45   : > { %656 = vsyncadd (%p919_p1), %s221_s11, 4294967168  ;;  %p920_p4 = scmp.eq.s32.totalorder %s739_s22, 0 }
  0x47   : > { %658 = dma.done.wait (%p920_p4), [#allocation6], 256   ;;  %p921_p6 = pmov %p920_p4 }
  0x48   : > { %vm259_vm0 = vcmask 261120   ;;  %v256_v0 = vld [vmem:[%s224_s12] sm:$0xff]  ;;  %v551_v7 = vld [vmem:[#allocation5 + $0x8] sm:$0xff]   ;;  %v685_v8 = vmov 0.0   ;;  %vm686_vm1 = vmmov 0   ;;  %v552_v9 = vld [vmem:[#allocation5] sm:$0xff]  }
  0x49   : > { %660 = vsyncadd (%p921_p6), [#allocation6], 4294967040  ;;  %v260_v1 = vsel %vm259_vm0, %v256_v0, 0.0  ;;  %482 = vmatprep.subr.bf16.mxu0 %v685_v8  ;;  %486 = vmatprep.mubr.msk.bf16.mxu0 %vm686_vm1, %v685_v8  ;;  %v469_v19 = vld [vmem:[%s902_s1] ss:$0 sm:$0xff]  ;;  %s476_s16 = sshll.u32 %s739_s22, 7 }
  0x4a   : > { %261 = vadd.xlane.f32.xlu0 %v260_v1  ;;  %483 = vmatpush3.bf16.msra.mxu0 %v551_v7  ;;  %v470_v21 = vld [vmem:[%s903_s2] ss:$0 sm:$0xff]  ;;  %s254_s17 = scalar_lea.vmem [#allocation7], %s466_s10  ;;  %s857_s28 = scalar_lea.hbm %s906_s5, %s476_s16 }
  0x4b   : > { %484 = vmatprep.subr.bf16.mxu0 %v685_v8  ;;  %v471_v25 = vld [vmem:[%s905_s4] ss:$0 sm:$0xff]  ;;  %s379_s23 = sshll.u32 %s254_s17, 4  ;;  %s366_s22 = scalar_lea.sflag [#allocation4], %s825_s9  ;;  %s859_s23 = int_to_ptr.vmem [resolvable:$true] %s379_s23 }
  0x4c   : > { %s611_s10 = scalar_lea.vmem %s859_s23, 128  ;;  %p922_p3 = scmp.ne.s32.totalorder %s916_s14, 0 }
  0x4d   : > { %p612_p8 = scmp.ne.s32.totalorder %s859_s23, %s611_s10  ;;  %s687_s11 = smov [#allocation7]  }
  0x4e   : > { %485 = vmatpush3.bf16.msra.mxu0 %v552_v9  ;;  %s615_s12 = sshll.u32 %s687_s11, 4  ;;  %s616_s12 = int_to_ptr.vmem [resolvable:$false] %s615_s12 }
  0x4f   : > { %p613_p11 = pnand %p612_p8, %p922_p3  ;;  %s617_s24 = scalar_lea.vmem %s616_s12, 256 }
  0x50   : > { %p618_p10 = scmp.lt.s32.totalorder %s859_s23, %s616_s12  ;;  %p619_p2 = scmp.lt.s32.totalorder %s617_s24, %s611_s10 }
  0x51   : > { %p614_p7 = pneg %p613_p11 }
  0x52   : > { %p620_p13 = por %p619_p2, %p618_p10 }
  0x54   : > { %p621_p0 = pnand %p620_p13, %p614_p7 }
  0xd3   : > { %v262_v2 = vpop.xlane.xlu0 %261 }
  0xd4   : > { %v264_v3 = vmul.f32 0.03125, %v262_v2 }
  0xd6   : > { %v265_v4 = vsub.f32 %v256_v0, %v264_v3 }
  0xd8   : > { %v266_v5 = vmul.f32 %v265_v4, %v265_v4 }
  0xda   : > { %v267_v6 = vsel %vm259_vm0, %v266_v5, 0.0 }
  0xdb   : > { %268 = vadd.xlane.f32.xlu0 %v267_v6 }
 0x164   : > { %v269_v10 = vpop.xlane.xlu0 %268 }
 0x165   : > { %v271_v11 = vmul.f32 0.032258064, %v269_v10 }
 0x167   : > { %553 = vrsqrt.f32 %v271_v11  ;;  %vm274_vm2 = vcmp.eq.f32.partialorder %v271_v11, inf  ;;  %v277_v14 = vand.u32 2147483648, %v271_v11  ;;  %vm276_vm3 = vcmp.eq.f32.partialorder %v271_v11, 0.0 }
 0x174   : > { %v554_v12 = vpop.eup %553 }
 0x175   : > { %v273_v13 = vmul.f32 %v554_v12, %v271_v11 }
 0x177   : > { %v275_v15 = vsel %vm274_vm2, %v271_v11, %v273_v13 }
 0x178   : > { %v278_v16 = vsel %vm276_vm3, %v277_v14, %v275_v15 }
 0x179   : > { %v279_v17 = vadd.f32 1e-06, %v278_v16 }
 0x17b   : > { %555 = vrcp.f32 %v279_v17 }
 0x188   : > { %v556_v18 = vpop.eup %555 }
 0x189   : > { %v281_v20 = vmul.f32 %v556_v18, %v265_v4 }
 0x18b   : > { %v288_v22 = vmul.f32 %v469_v19, %v281_v20 }
 0x18d   : > { %v295_v23 = vadd.f32 %v470_v21, %v288_v22 }
 0x18f   : > { %v296_v24 = vpack.c.bf16 %v295_v23, %v295_v23 }
 0x191   : > { %487 = vmatmul.mubr.msk.bf16.vlgmr.msra.gmra.mxu0 %vm259_vm0, %v296_v24 }
 0x251   : > { %v357_v26 = vpop.f32.mrf.mxu0 }
 0x252   : > { %v358_v27 = vadd.f32 %v471_v25, %v357_v26 }
 0x253   : > { %v488_v28 = vpop.f32.mrf.mxu0 }
 0x254   : > { %v363_v29 = vadd.f32 %v358_v27, %v256_v0 }
 0x255   : > { %v360_v30 = vpop.f32.mrf.mxu0 }
 0x256   : > { %364 = vst.msk [vmem:[%s254_s17] sm:$0xff] %vm259_vm0, %v363_v29 }
 0x257   : > { %v489_v31 = vpop.f32.mrf.mxu0 }
 0x258   : > { %624 = shalt.err (!%p621_p0)
}
 0x259   : > { %s625_s26 = scalar_lea.hbm %s857_s28, 128  ;;  %s629_s6 = scalar_lea.hbm %s906_s5, 256 }
 0x25a   : > { %p626_p5 = scmp.ne.s32.totalorder %s857_s28, %s625_s26  ;;  %p630_p1 = scmp.lt.s32.totalorder %s857_s28, %s906_s5 }
 0x25b   : > { %p631_p4 = scmp.lt.s32.totalorder %s629_s6, %s625_s26 }
 0x25c   : > { %p627_p9 = pnand %p626_p5, %p922_p3 }
 0x25d   : > { %p632_p6 = por %p631_p4, %p630_p1 }
 0x25e   : > { %p628_p12 = pneg %p627_p9 }
 0x260   : > { %p633_p8 = pnand %p632_p6, %p628_p12 }
 0x262   : > { %636 = shalt.err (!%p633_p8)
}
 0x263   : > { %496 = dma.vmem_to_hbm [thread:$0]  (%p922_p3), %s859_s23, 128, %s857_s28, %s366_s22  }
 0x264 PF: > { %s391_s16 = sand.u32 1, %s667_s18   ;;  %p923_p11 = scmp.ne.s32.totalorder %s912_s25, 0 }
 0x265   : > { %p924_p7 = scmp.ge.s32.totalorder %s679_s21, 2  ;;  %s392_s17 = scalar_lea.sflag [#allocation4], %s391_s16 }
 0x267   : > { %p507_p10 = pnand %p924_p7, %p923_p11 }
 0x269   : > { %p508_p2 = pneg %p507_p10 }
 0x26b   : > { %662 = dma.done.wait (%p508_p2), %s392_s17, 128  }
 0x26c   : > { %664 = vsyncadd (%p508_p2), %s392_s17, 4294967168  ;;  %p19_p13 = scmp.ge.s32.totalorder %s772_s30, 4   ;;  %s925_s18 = smov %s671_s19 }
 0x26d   : > { %s926_s19 = smov %s675_s20  ;;  %s927_s20 = smov %s789_s13 }
 0x26e   : > { %s928_s21 = smov %s772_s30  ;;  %21 = sbr.rel (!%p19_p13) target bundleno = 6 (0x6), region = 89 }
 0x273   :  { %397 = vsyncpa [#allocation3], 1 }
 0x274   :  { %399 = vsyncpa [#allocation3 + $0x1], 1 }
 0x275   :  { %400 = vsyncpa [#allocation6], 1 }
 0x276   :  { %401 = vsyncpa [#allocation4], 1 }
 0x277   :  { %403 = vsyncpa [#allocation4 + $0x1], 1 }

</bundles_post_ra>
